<compile_context>
chip_gen: v7x
topology: tpu7x:2x2x1
jax: 0.10.0
libtpu: 0.0.40
codegen_flags: <defaults>
</compile_context>

<pallas_src>
import numpy as np
import jax
import jax.numpy as jnp
from jax import lax
from jax.experimental import pallas as pl
from jax.experimental.pallas import tpu as pltpu

IMAGENET_MEAN = (0.485, 0.456, 0.406)
IMAGENET_STD = (0.229, 0.224, 0.225)


def _bilinear_matrix(n_out, n_in):
    """Interpolation matrix matching F.interpolate(bilinear, align_corners=False)."""
    scale = n_in / n_out
    i = np.arange(n_out, dtype=np.float64)
    src = np.clip((i + 0.5) * scale - 0.5, 0.0, n_in - 1)
    lo = np.floor(src).astype(np.int64)
    hi = np.minimum(lo + 1, n_in - 1)
    w_hi = (src - lo).astype(np.float32)
    w_lo = (1.0 - w_hi).astype(np.float32)
    m = np.zeros((n_out, n_in), dtype=np.float32)
    m[np.arange(n_out), lo] += w_lo
    m[np.arange(n_out), hi] += w_hi
    return m


def reid_loss_kernel(data_ref, label_ref, whs_ref, wwt_ref, off_ref, out_ref):
    """Fused preprocess + bilinear resize + L2-normalize + per-step L1 partial sum.

    data_ref/label_ref: (bt*C*Hi, Wi)  bt samples' channel planes stacked on sublanes.
    whs_ref: (C*Ho, C*Hi) block-diag kron(diag(0.5/std_c), Wh)  (scale folded in).
    wwt_ref: (Wi, Wo) width-resize matrix, transposed.
    off_ref: (C*Ho, 1) per-channel (0.5 - mean)/std offset.
    out_ref: (1, 8, 128) lane-dense partial-sum block, one store per grid step.
    """
    CHo, CHi = whs_ref.shape
    bt = data_ref.shape[0] // CHi

    wwt = wwt_ref[...]
    whs = whs_ref[...]
    off = off_ref[...]

    # Width pass: one large MXU dot per image stream over the whole bt block.
    td = jnp.dot(data_ref[...], wwt, preferred_element_type=jnp.float32)   # (bt*C*Hi, Wo)
    tl = jnp.dot(label_ref[...], wwt, preferred_element_type=jnp.float32)  # (bt*C*Hi, Wo)

    # Height pass + normalize + L1 on the tiny width results, per sample.
    # Per-iteration intermediates are only (C*Ho, Wo) (a couple of vregs), so a
    # static unrolled loop keeps all slices static and vreg pressure negligible;
    # the large td/tl values necessarily live across the loop either way.
    total = jnp.float32(0.0)
    for s in range(bt):
        rows = slice(s * CHi, (s + 1) * CHi)
        fd = jnp.dot(whs, td[rows, :], preferred_element_type=jnp.float32) + off
        fl = jnp.dot(whs, tl[rows, :], preferred_element_type=jnp.float32) + off
        # Per-sample L2 normalization of the flattened feature (no eps, matching
        # the PyTorch layer==15 divide-by-norm), then the L1 partial sum.
        inv_d = lax.rsqrt(jnp.sum(fd * fd))
        inv_l = lax.rsqrt(jnp.sum(fl * fl))
        total = total + jnp.sum(jnp.abs(fd * inv_d - fl * inv_l))

    # Single lane-dense (8, 128) store per grid step; wrapper reads [i, 0, 0].
    out_ref[...] = jnp.full((1, 8, 128), total, dtype=out_ref.dtype)


def reid_loss_forward(data, label, targets=None, *, size=(24, 8), batch_block=8):
    """JAX/Pallas equivalent of ReIDLoss.forward with layer=15.

    data, label: (B, 3, H, W) float32, values in [-1, 1], BGR channel order.
    Returns (l1_loss, 0, 0, 0, 0, 0) mirroring the PyTorch return tuple.

    batch_block: samples per grid step. The kernel is HBM-bound (~1.2 MiB of input
    per sample at 384x128 vs ~10 MFLOP), so amortizing the ~0.35 us per-step
    overhead is the main lever: 4-8 on v5e/v6e, 8-12 on v7x (64 MiB VMEM caps it
    around 10-12 at 384x128). The wrapper clamps to a divisor of B and keeps at
    least two grid steps when possible so both v7x TensorCores get work.
    """
    B, C, Hi, Wi = data.shape
    assert C == 3, "ReIDLoss preprocessing is defined for 3-channel BGR images"
    Ho, Wo = size

    bt = max(1, min(int(batch_block), B))
    while B % bt:
        bt -= 1
    if B // bt < 2 and bt > 1:           # keep >= 2 grid steps for the v7x 2-TC split
        bt = max(1, bt // 2)
        while B % bt:
            bt -= 1
    G = B // bt

    # Resize matrices (align_corners=False).
    wh = _bilinear_matrix(Ho, Hi)                         # (Ho, Hi)
    wwt = jnp.asarray(_bilinear_matrix(Wo, Wi).T)         # (Wi, Wo)

    # Fold the channel-permuted (BGR->RGB) imagenet affine into the resize:
    #   (resize(x/2 + 0.5) - mean)/std == resize(x) * (0.5/std) + (0.5 - mean)/std
    # (bilinear rows sum to 1). The image permute is replaced by permuting the
    # per-channel constants: the L1-of-L2-normalized loss is invariant to a common
    # channel reordering of both features.
    mean_bgr = np.asarray(IMAGENET_MEAN, np.float32)[::-1]
    std_bgr = np.asarray(IMAGENET_STD, np.float32)[::-1]
    scale_c = (0.5 / std_bgr).astype(np.float32)
    off_c = ((0.5 - mean_bgr) / std_bgr).astype(np.float32)
    # Height resize as a (C*Ho, C*Hi) block-diagonal with the per-channel scale
    # folded into its rows -> the kernel only adds the offset.
    whs = jnp.asarray(np.kron(np.diag(scale_c), wh).astype(np.float32))   # (C*Ho, C*Hi)
    off_col = jnp.asarray(np.repeat(off_c, Ho).reshape(C * Ho, 1))        # (C*Ho, 1)

    # Stack each sample's channel planes along the sublane axis in the wrapper
    # (free metadata reshape) so the kernel never copies full-res planes in VMEM.
    data2 = data.reshape(B * C * Hi, Wi)
    label2 = label.reshape(B * C * Hi, Wi)

    # VMEM budget (lane-padded): double-buffered data+label tiles, the lane-padded
    # (bt*C*Hi, Wo) width-pass intermediates, resident constants, plus slack.
    lane = 128
    in_tiles = 2 * 2 * bt * C * Hi * max(Wi, lane) * 4
    width_res = 2 * bt * C * Hi * lane * 4
    consts = 2 * (C * Ho * max(C * Hi, lane) + max(Wi, lane) * lane + C * Ho * lane) * 4
    est_vmem = in_tiles + width_res + consts + (4 << 20)
    cp = dict(dimension_semantics=("parallel",))
    if est_vmem > (16 << 20):            # above v5e's default scoped limit
        # No artificial clamp (the old min(.., 48 MiB) under-provisioned large bt);
        # an over-ask fails to compile with a clear error instead of starving the
        # pipeline window.
        cp["vmem_limit_bytes"] = int(est_vmem)

    partials = pl.pallas_call(
        reid_loss_kernel,
        out_shape=jax.ShapeDtypeStruct((G, 8, 128), jnp.float32),
        grid=(G,),
        in_specs=[
            pl.BlockSpec((bt * C * Hi, Wi), lambda i: (i, 0)),    # data planes
            pl.BlockSpec((bt * C * Hi, Wi), lambda i: (i, 0)),    # label planes
            pl.BlockSpec((C * Ho, C * Hi), lambda i: (0, 0)),     # scaled block-diag Wh
            pl.BlockSpec((Wi, Wo), lambda i: (0, 0)),             # Ww^T
            pl.BlockSpec((C * Ho, 1), lambda i: (0, 0)),          # per-channel offset
        ],
        out_specs=pl.BlockSpec((1, 8, 128), lambda i: (i, 0, 0)),
        compiler_params=pltpu.CompilerParams(**cp),
    )(data2, label2, whs, wwt, off_col)

    loss = jnp.sum(partials[:, 0, 0]) / jnp.float32(B * C * Ho * Wo)
    zero = jnp.zeros((1,), jnp.float32)
    return loss, zero, zero, zero, zero, zero


def _reference(data, label, size):
    """Pure-JAX reference for correctness checking (mirrors the PyTorch path)."""
    Ho, Wo = size

    def preprocess(x):
        x = x * 0.5 + 0.5
        x = x[:, ::-1, :, :]
        wh = jnp.asarray(_bilinear_matrix(Ho, x.shape[2]))
        ww = jnp.asarray(_bilinear_matrix(Wo, x.shape[3]))
        x = jnp.einsum('oi,bcij,pj->bcop', wh, x, ww,
                       precision=lax.Precision.HIGHEST)
        mean = jnp.asarray(IMAGENET_MEAN, jnp.float32).reshape(1, 3, 1, 1)
        std = jnp.asarray(IMAGENET_STD, jnp.float32).reshape(1, 3, 1, 1)
        return (x - mean) / std

    def feat(x):
        f = x.reshape(x.shape[0], -1)
        return f / jnp.linalg.norm(f, axis=1, keepdims=True)

    fd = feat(preprocess(data))
    fl = feat(preprocess(label))
    return jnp.mean(jnp.abs(fd - fl))


if __name__ == "__main__":
    key = jax.random.PRNGKey(0)
    k1, k2, k3, k4 = jax.random.split(key, 4)

    # Small shapes consistent with the module: (B, 3, H, W) BGR image in [-1, 1];
    # resize target keeps the module's 3:1 aspect (384x128 -> 24x8).
    B, C, H, W = 2, 3, 16, 16
    data = jax.random.uniform(k1, (B, C, H, W), jnp.float32, minval=-1.0, maxval=1.0)
    label = jax.random.uniform(k2, (B, C, H, W), jnp.float32, minval=-1.0, maxval=1.0)
    targets = jnp.zeros((B,), jnp.int32)  # unused by the forward path (as in PyTorch)

    outs = reid_loss_forward(data, label, targets, size=(24, 8))
    loss = jax.block_until_ready(outs[0])
    ref = _reference(data, label, (24, 8))
    assert jnp.allclose(loss, ref, atol=1e-3, rtol=1e-3), (loss, ref)

    # Also exercise the multi-sample-per-step path (bt > 1, grid >= 2).
    B2 = 8
    data2 = jax.random.uniform(k3, (B2, C, H, W), jnp.float32, minval=-1.0, maxval=1.0)
    label2 = jax.random.uniform(k4, (B2, C, H, W), jnp.float32, minval=-1.0, maxval=1.0)
    outs2 = reid_loss_forward(data2, label2, None, size=(24, 8), batch_block=4)
    loss2 = jax.block_until_ready(outs2[0])
    ref2 = _reference(data2, label2, (24, 8))
    assert jnp.allclose(loss2, ref2, atol=1e-3, rtol=1e-3), (loss2, ref2)

    print("KERNEL_OK")
</pallas_src>

<mosaic_0001>
module attributes {stable_mosaic.version = 11 : i64} {
  func.func @reid_loss_kernel(%arg0: i32, %arg1: memref<48x16xf32, #tpu.memory_space<vmem>>, %arg2: memref<48x16xf32, #tpu.memory_space<vmem>>, %arg3: memref<72x48xf32, #tpu.memory_space<vmem>>, %arg4: memref<16x8xf32, #tpu.memory_space<vmem>>, %arg5: memref<72x1xf32, #tpu.memory_space<vmem>>, %arg6: memref<1x8x128xf32, #tpu.memory_space<vmem>>) attributes {dimension_semantics = [#tpu.dimension_semantics<parallel>], iteration_bounds = array<i64: 2>, scalar_prefetch = 0 : i64, scratch_operands = 0 : i64, tpu.core_type = #tpu.core_type<tc>, window_params = [{transform_indices = @transform_0, window_bounds = array<i64: 48, 16>}, {transform_indices = @transform_1, window_bounds = array<i64: 48, 16>}, {pipeline_mode = #tpu.pipeline_mode<synchronous>, transform_indices = @transform_2, window_bounds = array<i64: 72, 48>}, {pipeline_mode = #tpu.pipeline_mode<synchronous>, transform_indices = @transform_3, window_bounds = array<i64: 16, 8>}, {pipeline_mode = #tpu.pipeline_mode<synchronous>, transform_indices = @transform_4, window_bounds = array<i64: 72, 1>}, {transform_indices = @transform_5, window_bounds = array<i64: 1, 8, 128>}]} {
    %c0 = arith.constant 0 : index
    %c0_0 = arith.constant 0 : index
    %0 = vector.load %arg4[%c0, %c0_0] : memref<16x8xf32, #tpu.memory_space<vmem>>, vector<16x8xf32>
    %c0_1 = arith.constant 0 : index
    %c0_2 = arith.constant 0 : index
    %1 = vector.load %arg3[%c0_1, %c0_2] : memref<72x48xf32, #tpu.memory_space<vmem>>, vector<72x48xf32>
    %c0_3 = arith.constant 0 : index
    %c0_4 = arith.constant 0 : index
    %2 = vector.load %arg5[%c0_3, %c0_4] : memref<72x1xf32, #tpu.memory_space<vmem>>, vector<72x1xf32>
    %c0_5 = arith.constant 0 : index
    %c0_6 = arith.constant 0 : index
    %3 = vector.load %arg1[%c0_5, %c0_6] : memref<48x16xf32, #tpu.memory_space<vmem>>, vector<48x16xf32>
    %cst = arith.constant dense<0.000000e+00> : vector<48x8xf32>
    %4 = tpu.matmul %3, %0, %cst {dimension_numbers = #tpu.dot_dimension_numbers<[1], [0], [0], [1], [0, 0, 1, 1], [], []>} : vector<48x16xf32>, vector<16x8xf32>, vector<48x8xf32> -> vector<48x8xf32>
    %c0_7 = arith.constant 0 : index
    %c0_8 = arith.constant 0 : index
    %5 = vector.load %arg2[%c0_7, %c0_8] : memref<48x16xf32, #tpu.memory_space<vmem>>, vector<48x16xf32>
    %cst_9 = arith.constant dense<0.000000e+00> : vector<48x8xf32>
    %6 = tpu.matmul %5, %0, %cst_9 {dimension_numbers = #tpu.dot_dimension_numbers<[1], [0], [0], [1], [0, 0, 1, 1], [], []>} : vector<48x16xf32>, vector<16x8xf32>, vector<48x8xf32> -> vector<48x8xf32>
    %cst_10 = arith.constant dense<0.000000e+00> : vector<72x8xf32>
    %7 = tpu.matmul %1, %4, %cst_10 {dimension_numbers = #tpu.dot_dimension_numbers<[1], [0], [0], [1], [0, 0, 1, 1], [], []>} : vector<72x48xf32>, vector<48x8xf32>, vector<72x8xf32> -> vector<72x8xf32>
    %8 = vector.broadcast %2 : vector<72x1xf32> to vector<72x8xf32>
    %9 = arith.addf %7, %8 : vector<72x8xf32>
    %cst_11 = arith.constant dense<0.000000e+00> : vector<72x8xf32>
    %10 = tpu.matmul %1, %6, %cst_11 {dimension_numbers = #tpu.dot_dimension_numbers<[1], [0], [0], [1], [0, 0, 1, 1], [], []>} : vector<72x48xf32>, vector<48x8xf32>, vector<72x8xf32> -> vector<72x8xf32>
    %11 = vector.broadcast %2 : vector<72x1xf32> to vector<72x8xf32>
    %12 = arith.addf %10, %11 : vector<72x8xf32>
    %13 = arith.mulf %9, %9 : vector<72x8xf32>
    %14 = vector.shape_cast %13 : vector<72x8xf32> to vector<1x72x8xf32>
    %cst_12 = arith.constant dense<0.000000e+00> : vector<1xf32>
    %15 = vector.multi_reduction <add>, %14, %cst_12 [1, 2] : vector<1x72x8xf32> to vector<1xf32>
    %16 = vector.shape_cast %15 : vector<1xf32> to vector<1x1x1xf32>
    %17 = vector.extract %16[0, 0, 0] : f32 from vector<1x1x1xf32>
    %18 = math.rsqrt %17 : f32
    %19 = arith.mulf %12, %12 : vector<72x8xf32>
    %20 = vector.shape_cast %19 : vector<72x8xf32> to vector<1x72x8xf32>
    %cst_13 = arith.constant dense<0.000000e+00> : vector<1xf32>
    %21 = vector.multi_reduction <add>, %20, %cst_13 [1, 2] : vector<1x72x8xf32> to vector<1xf32>
    %22 = vector.shape_cast %21 : vector<1xf32> to vector<1x1x1xf32>
    %23 = vector.extract %22[0, 0, 0] : f32 from vector<1x1x1xf32>
    %24 = math.rsqrt %23 : f32
    %25 = vector.broadcast %18 : f32 to vector<72x8xf32>
    %26 = arith.mulf %9, %25 : vector<72x8xf32>
    %27 = vector.broadcast %24 : f32 to vector<72x8xf32>
    %28 = arith.mulf %12, %27 : vector<72x8xf32>
    %29 = arith.subf %26, %28 : vector<72x8xf32>
    %30 = math.absf %29 : vector<72x8xf32>
    %31 = vector.shape_cast %30 : vector<72x8xf32> to vector<1x72x8xf32>
    %cst_14 = arith.constant dense<0.000000e+00> : vector<1xf32>
    %32 = vector.multi_reduction <add>, %31, %cst_14 [1, 2] : vector<1x72x8xf32> to vector<1xf32>
    %33 = vector.shape_cast %32 : vector<1xf32> to vector<1x1x1xf32>
    %34 = vector.extract %33[0, 0, 0] : f32 from vector<1x1x1xf32>
    %cst_15 = arith.constant 0.000000e+00 : f32
    %35 = arith.addf %cst_15, %34 : f32
    %36 = vector.broadcast %35 : f32 to vector<1x8x128xf32>
    %c0_16 = arith.constant 0 : index
    %c0_17 = arith.constant 0 : index
    %c0_18 = arith.constant 0 : index
    %37 = vector.load %arg6[%c0_16, %c0_17, %c0_18] : memref<1x8x128xf32, #tpu.memory_space<vmem>>, vector<1x8x128xf32>
    tpu.vector_store %arg6[%c0_16, %c0_17, %c0_18], %36 {strides = array<i32>} : memref<1x8x128xf32, #tpu.memory_space<vmem>>, vector<1x8x128xf32>,
    return
  }
  func.func @transform_0(%arg0: i32) -> (i32, i32) {
    %c0_i32 = arith.constant 0 : i32
    %c0_i32_0 = arith.constant 0 : i32
    return %arg0, %c0_i32 : i32, i32
  }
  func.func @transform_1(%arg0: i32) -> (i32, i32) {
    %c0_i32 = arith.constant 0 : i32
    %c0_i32_0 = arith.constant 0 : i32
    return %arg0, %c0_i32 : i32, i32
  }
  func.func @transform_2(%arg0: i32) -> (i32, i32) {
    %c0_i32 = arith.constant 0 : i32
    %c0_i32_0 = arith.constant 0 : i32
    %c0_i32_1 = arith.constant 0 : i32
    return %c0_i32, %c0_i32_0 : i32, i32
  }
  func.func @transform_3(%arg0: i32) -> (i32, i32) {
    %c0_i32 = arith.constant 0 : i32
    %c0_i32_0 = arith.constant 0 : i32
    %c0_i32_1 = arith.constant 0 : i32
    return %c0_i32, %c0_i32_0 : i32, i32
  }
  func.func @transform_4(%arg0: i32) -> (i32, i32) {
    %c0_i32 = arith.constant 0 : i32
    %c0_i32_0 = arith.constant 0 : i32
    %c0_i32_1 = arith.constant 0 : i32
    return %c0_i32, %c0_i32_0 : i32, i32
  }
  func.func @transform_5(%arg0: i32) -> (i32, i32, i32) {
    %c0_i32 = arith.constant 0 : i32
    %c0_i32_0 = arith.constant 0 : i32
    %c0_i32_1 = arith.constant 0 : i32
    return %arg0, %c0_i32, %c0_i32_0 : i32, i32, i32
  }
}

</mosaic_0001>

<bundles_post_ra>
// kernel: tpu_custom_call.1
= control target key start
LH: loop header
LB: loop body
LE: loop exit
PB: predicated region body
PF: predicated region fallthrough
CT: control target
= control target key end

     0   :  { %10 = vsyncpa [#allocation3], 0  ;;  %s1748_s0 = inlined_call_operand.vmem [shape: f32[96,16], index: 0, kind: input, shape index: {}]   ;;  %s1749_s1 = inlined_call_operand.vmem [shape: f32[96,16], index: 1, kind: input, shape index: {}]   ;;  %s1750_s2 = inlined_call_operand.vmem [shape: f32[72,48], index: 2, kind: input, shape index: {}]   ;;  %s1751_s3 = inlined_call_operand.vmem [shape: f32[16,8], index: 3, kind: input, shape index: {}]   ;;  %s1752_s4 = inlined_call_operand.vmem [shape: f32[72,1], index: 4, kind: input, shape index: {}]   ;;  %s1753_s5 = inlined_call_operand.hbm [shape: f32[2,8,128], index: 5, kind: output, shape index: {}]  }
   0x1   :  { %12 = vsyncpa [#allocation3 + $0x1], 0  ;;  %s1403_s18 = smov 0   ;;  %s1405_s19 = smov 0  }
   0x2   :  { %s1407_s20 = smov 0   ;;  %s1409_s21 = smov 0  }
   0x3 LB: > { %s1424_s22 = sadd.s32 4294967295, %s1366_s21   ;;  %s1028_s23 = sadd.s32 4294967294, %s1366_s21   ;;  %s1366_s21 = sphi %s1409_s21, %s1759_s21   ;;  %s1362_s20 = sphi %s1407_s20, %s1758_s20   ;;  %s1358_s19 = sphi %s1405_s19, %s1757_s19   ;;  %s1354_s18 = sphi %s1403_s18, %s1756_s18  }
   0x4   : > { %s1428_s24 = sadd.s32 1, %s1366_s21   ;;  %s140_s25 = sadd.s32 1, %s1362_s20 }
   0x5   : > { %s137_s26 = ssub.s32 %s1366_s21, %s1428_s24  ;;  %p150_p0 = scmp.ne.s32.totalorder %s1362_s20, %s1358_s19 }
   0x6   : > { %p138_p1 = scmp.eq.s32.totalorder %s137_s26, 0  ;;  %p151_p2 = scmp.eq.s32.totalorder %s1424_s22, 1 }
   0x7   : > { %p156_p3 = scmp.ne.s32.totalorder %s1358_s19, %s1354_s18  ;;  %p157_p4 = scmp.eq.s32.totalorder %s1028_s23, 1 }
   0x8   : > { %s1439_s27 = scalar_select %p138_p1, %s1362_s20, %s140_s25  }
   0x9   : > { %p1441_p5 = por %p151_p2, %p150_p0  ;;  %p1445_p6 = por %p157_p4, %p156_p3 }
   0xa   : > { %p1031_p7 = scmp.ge.s32.totalorder %s1366_s21, 1  ;;  %p202_p8 = scmp.lt.s32.totalorder %s1366_s21, 3 }
   0xc   : > { %p203_p9 = pnand %p1031_p7, %p202_p8 }
   0xd   : > { %v247_v0 = vld [vmem:[%s1751_s3] sm:$0xff] (!%p203_p9)  ;;  %v248_v1 = vld [vmem:[%s1751_s3 + $0x8] sm:$0xff] (!%p203_p9)  ;;  %s235_s9 = smul.u32 (!%p203_p9), 6, %s1424_s22  ;;  %vm273_vm0 = vcmask (!%p203_p9), 130048   ;;  %v1368_v15 = vmov (!%p203_p9), 0.0|0.0   ;;  %vm1369_vm1 = vmmov (!%p203_p9), 0  }
   0xe   : > { %206 = sbr.rel (%p203_p9) target bundleno = 1075 (0x433), region = 40  ;;  %v1219_v2 = vpack.c.bf16 (!%p203_p9), %v248_v1, %v247_v0  ;;  %v1370_v16 = vmov (!%p203_p9), 0.0   ;;  %v258_v17 = vld [vmem:[%s1752_s4] sm:$0xff] (!%p203_p9)  ;;  %v260_v18 = vld [vmem:[%s1752_s4 + $0x10] sm:$0xff] (!%p203_p9)  ;;  %v1371_v19 = vmov (!%p203_p9), 0   ;;  %v259_v20 = vld [vmem:[%s1752_s4 + $0x8] sm:$0xff] (!%p203_p9) }
   0xf   : > { %p236_p10 = scmp.lt.s32.totalorder (!%p203_p9), %s235_s9, 11  ;;  %1298 = vset.pattern.permute.xlu0 (!%p203_p9), %v1371_v19  ;;  %1299 = vset.pattern.permute.xlu1 (!%p203_p9), %v1371_v19  ;;  %v261_v21 = vld [vmem:[%s1752_s4 + $0x18] sm:$0xff] (!%p203_p9)  ;;  %v262_v22 = vld [vmem:[%s1752_s4 + $0x20] sm:$0xff] (!%p203_p9)  ;;  %v263_v23 = vld [vmem:[%s1752_s4 + $0x28] sm:$0xff] (!%p203_p9)  ;;  %vm551_vm2 = vcmask (!%p203_p9), 392192   ;;  %vm808_vm3 = vcmask (!%p203_p9), 64512  }
  0x10   : > { %1220 = vmatprep.subr.bf16.mxu0 (!%p203_p9), %v1219_v2  ;;  %1224 = vmatprep.subr.bf16.mxu1 (!%p203_p9), %v1219_v2  ;;  %v264_v24 = vld [vmem:[%s1752_s4 + $0x30] sm:$0xff] (!%p203_p9)  ;;  %v265_v25 = vld [vmem:[%s1752_s4 + $0x38] sm:$0xff] (!%p203_p9)  ;;  %v266_v26 = vld [vmem:[%s1752_s4 + $0x40] sm:$0xff] (!%p203_p9) }
  0x11   : > { %1222 = vmatpush3.bf16.msra.mxu0 (!%p203_p9), %v1219_v2  ;;  %1226 = vmatpush3.bf16.msra.mxu1 (!%p203_p9), %v1219_v2  ;;  %v249_v45 = vld [vmem:[%s1750_s2] sm:$0xff] (!%p203_p9)  ;;  %v250_v46 = vld [vmem:[%s1750_s2 + $0x8] sm:$0xff] (!%p203_p9)  ;;  %v251_v47 = vld [vmem:[%s1750_s2 + $0x10] sm:$0xff] (!%p203_p9) }
  0x12   : > { %1227 = vmatprep.subr.bf16.mxu0 (!%p203_p9), %v1368_v15  ;;  %1236 = vmatprep.subr.bf16.mxu1 (!%p203_p9), %v1368_v15  ;;  %v252_v48 = vld [vmem:[%s1750_s2 + $0x18] sm:$0xff] (!%p203_p9)  ;;  %v253_v49 = vld [vmem:[%s1750_s2 + $0x20] sm:$0xff] (!%p203_p9)  ;;  %v254_v50 = vld [vmem:[%s1750_s2 + $0x28] sm:$0xff] (!%p203_p9) }
  0x13   : > { %508 = vperm.xlu0 (!%p203_p9), %1298, %v258_v17   ;;  %518 = vperm.xlu1 (!%p203_p9), %1299, %v260_v18   ;;  %v255_v51 = vld [vmem:[%s1750_s2 + $0x30] sm:$0xff] (!%p203_p9)  ;;  %v256_v52 = vld [vmem:[%s1750_s2 + $0x38] sm:$0xff] (!%p203_p9)  ;;  %v257_v53 = vld [vmem:[%s1750_s2 + $0x40] sm:$0xff] (!%p203_p9) }
  0x15   : > { %s1761_s9 = smov (!%p236_p10, %s235_s9), 11 }
  0x16   : > { %s1033_s10 = sshll.u32 %s1761_s9, 3  ;;  %s232_s9 = sand.u32 1, %s1358_s19  }
  0x17   : > { %s239_s13 = scalar_lea.vmem %s1748_s0, %s1033_s10  ;;  %s245_s16 = scalar_lea.vmem %s1749_s1, %s1033_s10  ;;  %513 = vperm.xlu0 %1298, %v259_v20   ;;  %523 = vperm.xlu1 %1299, %v261_v21  }
  0x18   : > { %v267_v3 = vld [vmem:[%s239_s13] sm:$0xff]  ;;  %v268_v5 = vld [vmem:[%s239_s13 + $0x8] sm:$0xff]  ;;  %v269_v7 = vld [vmem:[%s239_s13 + $0x10] sm:$0xff]  ;;  %s1032_s10 = sshll.u32 %s232_s9, 3  ;;  %s944_s23 = scalar_lea.sflag [#allocation3], %s232_s9 }
  0x19   : > { %v387_v4 = vld [vmem:[%s245_s16] sm:$0xff]  ;;  %1119 = vmatprep.mubr.msk.f32.mxu0 %vm273_vm0, %v267_v3  ;;  %v388_v6 = vld [vmem:[%s245_s16 + $0x8] sm:$0xff]  ;;  %v389_v8 = vld [vmem:[%s245_s16 + $0x10] sm:$0xff]  ;;  %s234_s11 = scalar_lea.vmem [#allocation2], %s1032_s10 }
  0x1a   : > { %1132 = vmatprep.mubr.msk.f32.mxu1 %vm273_vm0, %v387_v4  ;;  %1120 = vmatmul.mubr.msk.f32.vlgmr.msra.gmra.mrb[0].mxu0 %vm273_vm0, %v268_v5  ;;  %v270_v9 = vld [vmem:[%s239_s13 + $0x18] sm:$0xff]  ;;  %v271_v11 = vld [vmem:[%s239_s13 + $0x20] sm:$0xff]  ;;  %v272_v13 = vld [vmem:[%s239_s13 + $0x28] sm:$0xff]  ;;  %s957_s12 = sshll.u32 %s234_s11, 4  ;;  %s1066_s13 = sshll.u32 %s1424_s22, 7  ;;  %s1703_s12 = int_to_ptr.vmem [resolvable:$true] %s957_s12 }
  0x1b   : > { %1133 = vmatmul.mubr.msk.f32.vlgmr.msra.gmra.mrb[0].mxu1 %vm273_vm0, %v388_v6  ;;  %1122 = vmatprep.mubr.msk.f32.mxu0 %vm273_vm0, %v269_v7  ;;  %v390_v10 = vld [vmem:[%s245_s16 + $0x18] sm:$0xff]  ;;  %v391_v12 = vld [vmem:[%s245_s16 + $0x20] sm:$0xff]  ;;  %v392_v14 = vld [vmem:[%s245_s16 + $0x28] sm:$0xff]  ;;  %s1708_s17 = scalar_lea.hbm %s1753_s5, %s1066_s13  ;;  %s1304_s25 = scalar_lea.vmem %s1703_s12, 128 }
  0x1c   : > { %1135 = vmatprep.mubr.msk.f32.mxu1 %vm273_vm0, %v389_v8  ;;  %528 = vperm.xlu0 %1298, %v262_v22   ;;  %p1305_p11 = scmp.ne.s32.totalorder %s1703_s12, %s1304_s25  ;;  %s1372_s22 = smov [#allocation2]  }
  0x1d   : > { %533 = vperm.xlu1 %1299, %v263_v23   ;;  %s1308_s26 = sshll.u32 %s1372_s22, 4  ;;  %s1309_s26 = int_to_ptr.vmem [resolvable:$false] %s1308_s26 }
  0x1e   : > { %1123 = vmatmul.mubr.msk.f32.gmra.mrb[2].mxu0 %vm273_vm0, %v270_v9  ;;  %p1306_p12 = pnand %p1305_p11, %p1441_p5  ;;  %p1311_p0 = scmp.lt.s32.totalorder %s1703_s12, %s1309_s26 }
  0x1f   : > { %1136 = vmatmul.mubr.msk.f32.gmra.mrb[2].mxu1 %vm273_vm0, %v390_v10  ;;  %1125 = vmatprep.mubr.msk.f32.mxu0 %vm273_vm0, %v271_v11 }
  0x20   : > { %1138 = vmatprep.mubr.msk.f32.mxu1 %vm273_vm0, %v391_v12  ;;  %538 = vperm.xlu0 %1298, %v264_v24   ;;  %p1307_p13 = pneg %p1306_p12 }
  0x21   : > { %543 = vperm.xlu1 %1299, %v265_v25  }
  0x22   : > { %1126 = vmatmul.mubr.msk.f32.gmra.mrb[4].mxu0 %vm273_vm0, %v272_v13 }
  0x23   : > { %1139 = vmatmul.mubr.msk.f32.gmra.mrb[4].mxu1 %vm273_vm0, %v392_v14  ;;  %1153 = vmatprep.mubr.msk.f32.mxu0 %vm1369_vm1, %v1370_v16 }
  0x24   : > { %1192 = vmatprep.mubr.msk.f32.mxu1 %vm1369_vm1, %v1370_v16  ;;  %548 = vperm.xlu0 %1298, %v266_v26  }
  0x92   : > { %v509_v54 = vpop.permute.xlu0 %508  ;;  %v519_v59 = vpop.permute.xlu1 %518 }
  0x96   : > { %v514_v0 = vpop.permute.xlu0 %513  ;;  %v524_v9 = vpop.permute.xlu1 %523 }
  0x9b   : > { %v529_v18 = vpop.permute.xlu0 %528 }
  0xed   : > { %v1121_v27 = vpop.f32.mrb[0].mxu0 }
  0xee   : > { %v1134_v28 = vpop.f32.mrb[0].mxu1  ;;  %v358_v29 = vpop.f32.mrb[1].mxu0 }
  0xef   : > { %v477_v30 = vpop.f32.mrb[1].mxu1  ;;  %v1228_v31 = vpack.c.bf16 %v1121_v27, %v358_v29 }
  0xf0   : > { %v1237_v32 = vpack.c.bf16 %v1134_v28, %v477_v30 }
  0xf1   : > { %v1124_v33 = vpop.f32.mrb[2].mxu0  ;;  %1229 = vmatpush3.bf16.msra.mxu0 %v1228_v31 }
  0xf2   : > { %v1137_v34 = vpop.f32.mrb[2].mxu1  ;;  %1238 = vmatpush3.bf16.msra.mxu1 %v1237_v32  ;;  %v368_v35 = vpop.f32.mrb[3].mxu0  ;;  %1230 = vmatprep.subr.bf16.mxu0 %v1368_v15 }
  0xf3   : > { %v487_v36 = vpop.f32.mrb[3].mxu1  ;;  %1239 = vmatprep.subr.bf16.mxu1 %v1368_v15  ;;  %v1231_v37 = vpack.c.bf16 %v1124_v33, %v368_v35 }
  0xf4   : > { %v1240_v38 = vpack.c.bf16 %v1137_v34, %v487_v36  ;;  %v534_v34 = vpop.permute.xlu1 %533 }
  0xf5   : > { %v1127_v39 = vpop.f32.mrb[4].mxu0  ;;  %1232 = vmatpush3.bf16.msra.mxu0 %v1231_v37 }
  0xf6   : > { %v1140_v40 = vpop.f32.mrb[4].mxu1  ;;  %1241 = vmatpush3.bf16.msra.mxu1 %v1240_v38  ;;  %v378_v41 = vpop.f32.mrb[5].mxu0  ;;  %1233 = vmatprep.subr.bf16.mxu0 %v1368_v15 }
  0xf7   : > { %v497_v42 = vpop.f32.mrb[5].mxu1  ;;  %1242 = vmatprep.subr.bf16.mxu1 %v1368_v15  ;;  %v1234_v43 = vpack.c.bf16 %v1127_v39, %v378_v41 }
  0xf8   : > { %v1243_v44 = vpack.c.bf16 %v1140_v40, %v497_v42 }
  0xf9   : > { %1235 = vmatpush3.bf16.msra.mxu0 %v1234_v43 }
  0xfa   : > { %1244 = vmatpush3.bf16.msra.mxu1 %v1243_v44 }
  0xfc   : > { %1154 = vmatmul.mubr.msk.f32.vlgmr.msra.gmra.mrb[6].mxu0 %vm551_vm2, %v249_v45 }
  0xfd   : > { %1193 = vmatmul.mubr.msk.f32.vlgmr.msra.gmra.mrb[6].mxu1 %vm551_vm2, %v249_v45  ;;  %1156 = vmatprep.mubr.msk.f32.mxu0 %vm1369_vm1, %v1370_v16 }
  0xfe   : > { %1195 = vmatprep.mubr.msk.f32.mxu1 %vm1369_vm1, %v1370_v16 }
 0x100   : > { %1157 = vmatmul.mubr.msk.f32.gmra.mrb[8].mxu0 %vm551_vm2, %v250_v46 }
 0x101   : > { %1196 = vmatmul.mubr.msk.f32.gmra.mrb[8].mxu1 %vm551_vm2, %v250_v46  ;;  %1159 = vmatprep.mubr.msk.f32.mxu0 %vm1369_vm1, %v1370_v16 }
 0x102   : > { %1198 = vmatprep.mubr.msk.f32.mxu1 %vm1369_vm1, %v1370_v16 }
 0x104   : > { %1160 = vmatmul.mubr.msk.f32.gmra.mrb[10].mxu0 %vm551_vm2, %v251_v47 }
 0x105   : > { %1199 = vmatmul.mubr.msk.f32.gmra.mrb[10].mxu1 %vm551_vm2, %v251_v47  ;;  %1162 = vmatprep.mubr.msk.f32.mxu0 %vm1369_vm1, %v1370_v16 }
 0x106   : > { %1201 = vmatprep.mubr.msk.f32.mxu1 %vm1369_vm1, %v1370_v16 }
 0x108   : > { %1163 = vmatmul.mubr.msk.f32.gmra.mrb[12].mxu0 %vm551_vm2, %v252_v48 }
 0x109   : > { %1202 = vmatmul.mubr.msk.f32.gmra.mrb[12].mxu1 %vm551_vm2, %v252_v48  ;;  %1165 = vmatprep.mubr.msk.f32.mxu0 %vm1369_vm1, %v1370_v16  ;;  %v539_v48 = vpop.permute.xlu0 %538 }
 0x10a   : > { %1204 = vmatprep.mubr.msk.f32.mxu1 %vm1369_vm1, %v1370_v16 }
 0x10c   : > { %1166 = vmatmul.mubr.msk.f32.gmra.mrb[14].mxu0 %vm551_vm2, %v253_v49 }
 0x10d   : > { %1205 = vmatmul.mubr.msk.f32.gmra.mrb[14].mxu1 %vm551_vm2, %v253_v49  ;;  %1168 = vmatprep.mubr.msk.f32.mxu0 %vm1369_vm1, %v1370_v16 }
 0x10e   : > { %1207 = vmatprep.mubr.msk.f32.mxu1 %vm1369_vm1, %v1370_v16 }
 0x110   : > { %1169 = vmatmul.mubr.msk.f32.gmra.mrb[16].mxu0 %vm551_vm2, %v254_v50 }
 0x111   : > { %1208 = vmatmul.mubr.msk.f32.gmra.mrb[16].mxu1 %vm551_vm2, %v254_v50  ;;  %1171 = vmatprep.mubr.msk.f32.mxu0 %vm1369_vm1, %v1370_v16 }
 0x112   : > { %1210 = vmatprep.mubr.msk.f32.mxu1 %vm1369_vm1, %v1370_v16 }
 0x114   : > { %1172 = vmatmul.mubr.msk.f32.gmra.mrb[18].mxu0 %vm551_vm2, %v255_v51 }
 0x115   : > { %1211 = vmatmul.mubr.msk.f32.gmra.mrb[18].mxu1 %vm551_vm2, %v255_v51  ;;  %1174 = vmatprep.mubr.msk.f32.mxu0 %vm1369_vm1, %v1370_v16 }
 0x116   : > { %1213 = vmatprep.mubr.msk.f32.mxu1 %vm1369_vm1, %v1370_v16 }
 0x118   : > { %1175 = vmatmul.mubr.msk.f32.gmra.mrb[20].mxu0 %vm551_vm2, %v256_v52 }
 0x119   : > { %1214 = vmatmul.mubr.msk.f32.gmra.mrb[20].mxu1 %vm551_vm2, %v256_v52  ;;  %1177 = vmatprep.mubr.msk.f32.mxu0 %vm1369_vm1, %v1370_v16 }
 0x11a   : > { %1216 = vmatprep.mubr.msk.f32.mxu1 %vm1369_vm1, %v1370_v16 }
 0x11c   : > { %1178 = vmatmul.mubr.msk.f32.gmra.mrb[22].mxu0 %vm551_vm2, %v257_v53 }
 0x11d   : > { %1217 = vmatmul.mubr.msk.f32.gmra.mrb[22].mxu1 %vm551_vm2, %v257_v53 }
 0x1cf   : > { %v645_v55 = vpop.f32.mrb[6].mxu0 }
 0x1d0   : > { %v755_v56 = vpop.f32.mrb[6].mxu1  ;;  %v1155_v57 = vpop.f32.mrb[7].mxu0  ;;  %v1596_v16 = vadd.f32 %v645_v55, %v509_v54 }
 0x1d1   : > { %v1194_v58 = vpop.f32.mrb[7].mxu1  ;;  %v1584_v1 = vadd.f32 %v755_v56, %v509_v54 }
 0x1d2   : > { %v799_v29 = vmul.f32 %v1596_v16, %v1596_v16 }
 0x1d3   : > { %v650_v60 = vpop.f32.mrb[8].mxu0  ;;  %v838_v7 = vmul.f32 %v1584_v1, %v1584_v1 }
 0x1d4   : > { %v760_v61 = vpop.f32.mrb[8].mxu1  ;;  %v1158_v62 = vpop.f32.mrb[9].mxu0  ;;  %v1594_v13 = vadd.f32 %v650_v60, %v514_v0  ;;  %v809_v45 = vsel %vm808_vm3, %v799_v29, 0.0 }
 0x1d5   : > { %v1197_v63 = vpop.f32.mrb[9].mxu1  ;;  %v1586_v2 = vadd.f32 %v760_v61, %v514_v0  ;;  %v847_v19 = vsel %vm808_vm3, %v838_v7, 0.0 }
 0x1d6   : > { %v800_v26 = vmul.f32 %v1594_v13, %v1594_v13 }
 0x1d7   : > { %v655_v3 = vpop.f32.mrb[10].mxu0  ;;  %v839_v8 = vmul.f32 %v1586_v2, %v1586_v2 }
 0x1d8   : > { %v765_v4 = vpop.f32.mrb[10].mxu1  ;;  %v1161_v5 = vpop.f32.mrb[11].mxu0  ;;  %v1598_v17 = vadd.f32 %v655_v3, %v519_v59  ;;  %v810_v40 = vsel %vm808_vm3, %v800_v26, 0.0 }
 0x1d9   : > { %v1200_v6 = vpop.f32.mrb[11].mxu1  ;;  %v1592_v10 = vadd.f32 %v765_v4, %v519_v59  ;;  %v848_v20 = vsel %vm808_vm3, %v839_v8, 0.0  ;;  %v811_v52 = vadd.f32 %v810_v40, %v809_v45  ;;  %v544_v4 = vpop.permute.xlu1 %543 }
 0x1da   : > { %v801_v30 = vmul.f32 %v1598_v17, %v1598_v17  ;;  %v849_v31 = vadd.f32 %v848_v20, %v847_v19 }
 0x1db   : > { %v660_v11 = vpop.f32.mrb[12].mxu0  ;;  %v840_v21 = vmul.f32 %v1592_v10, %v1592_v10 }
 0x1dc   : > { %v770_v12 = vpop.f32.mrb[12].mxu1  ;;  %v1164_v14 = vpop.f32.mrb[13].mxu0  ;;  %v1606_v23 = vadd.f32 %v660_v11, %v524_v9  ;;  %v812_v47 = vsel %vm808_vm3, %v801_v30, 0.0 }
 0x1dd   : > { %v1203_v15 = vpop.f32.mrb[13].mxu1  ;;  %v1604_v22 = vadd.f32 %v770_v12, %v524_v9  ;;  %v850_v32 = vsel %vm808_vm3, %v840_v21, 0.0  ;;  %v813_v62 = vadd.f32 %v812_v47, %v811_v52 }
 0x1de   : > { %v802_v37 = vmul.f32 %v1606_v23, %v1606_v23  ;;  %v851_v46 = vadd.f32 %v850_v32, %v849_v31 }
 0x1df   : > { %v665_v24 = vpop.f32.mrb[14].mxu0  ;;  %v841_v33 = vmul.f32 %v1604_v22, %v1604_v22 }
 0x1e0   : > { %v775_v25 = vpop.f32.mrb[14].mxu1  ;;  %v1167_v27 = vpop.f32.mrb[15].mxu0  ;;  %v1617_v35 = vadd.f32 %v665_v24, %v529_v18  ;;  %v814_v53 = vsel %vm808_vm3, %v802_v37, 0.0 }
 0x1e1   : > { %v1206_v28 = vpop.f32.mrb[15].mxu1  ;;  %v1619_v36 = vadd.f32 %v775_v25, %v529_v18  ;;  %v852_v49 = vsel %vm808_vm3, %v841_v33, 0.0  ;;  %v815_v7 = vadd.f32 %v814_v53, %v813_v62  ;;  %v549_v24 = vpop.permute.xlu0 %548 }
 0x1e2   : > { %v803_v50 = vmul.f32 %v1617_v35, %v1617_v35  ;;  %v853_v63 = vadd.f32 %v852_v49, %v851_v46 }
 0x1e3   : > { %v670_v38 = vpop.f32.mrb[16].mxu0  ;;  %v842_v51 = vmul.f32 %v1619_v36, %v1619_v36 }
 0x1e4   : > { %v780_v39 = vpop.f32.mrb[16].mxu1  ;;  %v1624_v41 = vadd.f32 %v670_v38, %v534_v34  ;;  %v1170_v43 = vpop.f32.mrb[17].mxu0  ;;  %v816_v0 = vsel %vm808_vm3, %v803_v50, 0.0 }
 0x1e5   : > { %v1626_v42 = vadd.f32 %v780_v39, %v534_v34  ;;  %v1209_v44 = vpop.f32.mrb[17].mxu1  ;;  %v854_v3 = vsel %vm808_vm3, %v842_v51, 0.0  ;;  %v817_v20 = vadd.f32 %v816_v0, %v815_v7 }
 0x1e6   : > { %v804_v56 = vmul.f32 %v1624_v41, %v1624_v41  ;;  %v855_v21 = vadd.f32 %v854_v3, %v853_v63 }
 0x1e7   : > { %v675_v54 = vpop.f32.mrb[18].mxu0  ;;  %v843_v57 = vmul.f32 %v1626_v42, %v1626_v42 }
 0x1e8   : > { %v785_v55 = vpop.f32.mrb[18].mxu1  ;;  %v1640_v58 = vadd.f32 %v675_v54, %v539_v48  ;;  %v1173_v60 = vpop.f32.mrb[19].mxu0  ;;  %v818_v11 = vsel %vm808_vm3, %v804_v56, 0.0 }
 0x1e9   : > { %v1642_v59 = vadd.f32 %v785_v55, %v539_v48  ;;  %v1212_v61 = vpop.f32.mrb[19].mxu1  ;;  %v856_v12 = vsel %vm808_vm3, %v843_v57, 0.0  ;;  %v819_v29 = vadd.f32 %v818_v11, %v817_v20 }
 0x1ea   : > { %v805_v5 = vmul.f32 %v1640_v58, %v1640_v58  ;;  %v857_v30 = vadd.f32 %v856_v12, %v855_v21 }
 0x1eb   : > { %v844_v6 = vmul.f32 %v1642_v59, %v1642_v59  ;;  %v680_v8 = vpop.f32.mrb[20].mxu0 }
 0x1ec   : > { %v790_v9 = vpop.f32.mrb[20].mxu1  ;;  %v1652_v14 = vadd.f32 %v680_v8, %v544_v4  ;;  %v1176_v18 = vpop.f32.mrb[21].mxu0  ;;  %v820_v25 = vsel %vm808_vm3, %v805_v5, 0.0 }
 0x1ed   : > { %v1654_v15 = vadd.f32 %v790_v9, %v544_v4  ;;  %v1215_v19 = vpop.f32.mrb[21].mxu1  ;;  %v858_v26 = vsel %vm808_vm3, %v844_v6, 0.0  ;;  %v821_v44 = vadd.f32 %v820_v25, %v819_v29 }
 0x1ee   : > { %v806_v27 = vmul.f32 %v1652_v14, %v1652_v14  ;;  %v859_v43 = vadd.f32 %v858_v26, %v857_v30 }
 0x1ef   : > { %v845_v28 = vmul.f32 %v1654_v15, %v1654_v15  ;;  %v685_v31 = vpop.f32.mrb[22].mxu0 }
 0x1f0   : > { %v795_v32 = vpop.f32.mrb[22].mxu1  ;;  %v1662_v33 = vadd.f32 %v685_v31, %v549_v24  ;;  %v1179_v37 = vpop.f32.mrb[23].mxu0  ;;  %v822_v39 = vsel %vm808_vm3, %v806_v27, 0.0 }
 0x1f1   : > { %v1664_v34 = vadd.f32 %v795_v32, %v549_v24  ;;  %v860_v38 = vsel %vm808_vm3, %v845_v28, 0.0  ;;  %v1218_v40 = vpop.f32.mrb[23].mxu1  ;;  %v823_v48 = vadd.f32 %v822_v39, %v821_v44 }
 0x1f2   : > { %v807_v45 = vmul.f32 %v1662_v33, %v1662_v33  ;;  %v861_v47 = vadd.f32 %v860_v38, %v859_v43 }
 0x1f3   : > { %v846_v46 = vmul.f32 %v1664_v34, %v1664_v34 }
 0x1f4   : > { %v824_v50 = vsel %vm808_vm3, %v807_v45, 0.0 }
 0x1f5   : > { %v862_v49 = vsel %vm808_vm3, %v846_v46, 0.0  ;;  %v825_v52 = vadd.f32 %v824_v50, %v823_v48 }
 0x1f6   : > { %v863_v51 = vadd.f32 %v862_v49, %v861_v47 }
 0x1f7   : > { %826 = vadd.xlane.f32.xlu1 %v825_v52 }
 0x1f8   : > { %864 = vadd.xlane.f32.xlu0 %v863_v51 }
 0x284   : > { %v827_v53 = vpop.xlane.xlu1 %826 }
 0x285   : > { %v828_v54 = vrot.slane %v827_v53, 4  ;;  %v865_v62 = vpop.xlane.xlu0 %864 }
 0x286   : > { %v866_v63 = vrot.slane %v865_v62, 4 }
 0x287   : > { %v829_v55 = vadd.f32 %v828_v54, %v827_v53 }
 0x288   : > { %v867_v0 = vadd.f32 %v866_v63, %v865_v62 }
 0x289   : > { %v830_v56 = vrot.slane %v829_v55, 2 }
 0x28a   : > { %v868_v3 = vrot.slane %v867_v0, 2 }
 0x28b   : > { %v831_v57 = vadd.f32 %v830_v56, %v829_v55 }
 0x28c   : > { %v869_v5 = vadd.f32 %v868_v3, %v867_v0 }
 0x28d   : > { %v832_v60 = vrot.slane %v831_v57, 1 }
 0x28e   : > { %v870_v6 = vrot.slane %v869_v5, 1 }
 0x28f   : > { %v833_v61 = vadd.f32 %v832_v60, %v831_v57 }
 0x290   : > { %v871_v8 = vadd.f32 %v870_v6, %v869_v5 }
 0x291   : > { %1245 = vpush %v833_v61 }
 0x2c2   : > { %s1246_s30 = spop %1245 }
 0x2c3   : > { %v835_v4 = vstv %s1246_s30  ;;  %s1310_s30 = scalar_lea.vmem %s1309_s26, 256 }
 0x2c4   : > { %1300 = vrsqrt.f32 %v835_v4  ;;  %p1312_p1 = scmp.lt.s32.totalorder %s1310_s30, %s1304_s25 }
 0x2c6   : > { %p1313_p2 = por %p1312_p1, %p1311_p0 }
 0x2c8   : > { %p1314_p3 = pnand %p1313_p2, %p1307_p13 }
 0x2ce   : > { %v1301_v7 = vpop.eup %1300 }
 0x2cf   : > { %1247 = vpush %v1301_v7 }
 0x2d0   : > { %1249 = vpush %v871_v8 }
 0x300   : > { %s1248_s6 = spop %1247 }
 0x301   : > { %s1250_s7 = spop %1249  ;;  %v876_v12 = vstv %s1248_s6 }
 0x302   : > { %v873_v9 = vstv %s1250_s7  ;;  %v877_v18 = vmul.f32 %v876_v12, %v1596_v16  ;;  %v878_v19 = vmul.f32 %v876_v12, %v1594_v13  ;;  %v879_v21 = vmul.f32 %v876_v12, %v1598_v17 }
 0x303   : > { %1302 = vrsqrt.f32 %v873_v9  ;;  %v880_v28 = vmul.f32 %v876_v12, %v1606_v23  ;;  %v881_v13 = vmul.f32 %v876_v12, %v1617_v35  ;;  %v883_v23 = vmul.f32 %v876_v12, %v1640_v58 }
 0x304   : > { %v885_v58 = vmul.f32 %v876_v12, %v1662_v33 }
 0x30d   : > { %v1303_v11 = vpop.eup %1302 }
 0x30e   : > { %1251 = vpush %v1303_v11 }
 0x33f   : > { %s1252_s8 = spop %1251 }
 0x340   : > { %v886_v20 = vstv %s1252_s8 }
 0x341   : > { %v887_v24 = vmul.f32 %v886_v20, %v1584_v1  ;;  %v888_v25 = vmul.f32 %v886_v20, %v1586_v2  ;;  %v889_v26 = vmul.f32 %v886_v20, %v1592_v10  ;;  %v890_v27 = vmul.f32 %v886_v20, %v1604_v22 }
 0x342   : > { %v891_v29 = vmul.f32 %v886_v20, %v1619_v36  ;;  %v892_v32 = vmul.f32 %v886_v20, %v1626_v42  ;;  %v882_v2 = vmul.f32 %v876_v12, %v1624_v41  ;;  %v893_v10 = vmul.f32 %v886_v20, %v1642_v59 }
 0x343   : > { %v896_v30 = vsub.f32 %v877_v18, %v887_v24  ;;  %v897_v31 = vsub.f32 %v878_v19, %v888_v25  ;;  %v898_v16 = vsub.f32 %v879_v21, %v889_v26  ;;  %v899_v17 = vsub.f32 %v880_v28, %v890_v27 }
 0x344   : > { %v900_v38 = vsub.f32 %v881_v13, %v891_v29  ;;  %v894_v36 = vmul.f32 %v886_v20, %v1654_v15  ;;  %v901_v39 = vsub.f32 %v882_v2, %v892_v32  ;;  %v884_v42 = vmul.f32 %v876_v12, %v1652_v14 }
 0x345   : > { %v905_v37 = vand.u32 2147483647, %v896_v30  ;;  %v906_v1 = vand.u32 2147483647, %v897_v31  ;;  %v907_v22 = vand.u32 2147483647, %v898_v16  ;;  %v895_v45 = vmul.f32 %v886_v20, %v1664_v34 }
 0x346   : > { %v908_v40 = vand.u32 2147483647, %v899_v17  ;;  %v902_v41 = vsub.f32 %v883_v23, %v893_v10  ;;  %v909_v46 = vand.u32 2147483647, %v900_v38  ;;  %v903_v48 = vsub.f32 %v884_v42, %v894_v36 }
 0x347   : > { %v914_v43 = vsel %vm808_vm3, %v905_v37, 0.0  ;;  %v915_v35 = vsel %vm808_vm3, %v906_v1, 0.0  ;;  %v917_v59 = vsel %vm808_vm3, %v907_v22, 0.0  ;;  %v910_v15 = vand.u32 2147483647, %v901_v39 }
 0x348   : > { %v916_v44 = vadd.f32 %v915_v35, %v914_v43  ;;  %v919_v49 = vsel %vm808_vm3, %v908_v40, 0.0  ;;  %v904_v51 = vsub.f32 %v885_v58, %v895_v45  ;;  %v911_v52 = vand.u32 2147483647, %v902_v41 }
 0x349   : > { %v921_v53 = vsel %vm808_vm3, %v909_v46, 0.0  ;;  %v912_v54 = vand.u32 2147483647, %v903_v48  ;;  %v923_v34 = vsel %vm808_vm3, %v910_v15, 0.0 }
 0x34a   : > { %v918_v47 = vadd.f32 %v917_v59, %v916_v44  ;;  %v913_v56 = vand.u32 2147483647, %v904_v51  ;;  %v925_v57 = vsel %vm808_vm3, %v911_v52, 0.0 }
 0x34b   : > { %v927_v33 = vsel %vm808_vm3, %v912_v54, 0.0 }
 0x34c   : > { %v920_v50 = vadd.f32 %v919_v49, %v918_v47  ;;  %v929_v62 = vsel %vm808_vm3, %v913_v56, 0.0 }
 0x34e   : > { %v922_v14 = vadd.f32 %v921_v53, %v920_v50 }
 0x350   : > { %v924_v55 = vadd.f32 %v923_v34, %v922_v14 }
 0x352   : > { %v926_v60 = vadd.f32 %v925_v57, %v924_v55 }
 0x354   : > { %v928_v61 = vadd.f32 %v927_v33, %v926_v60 }
 0x356   : > { %v930_v63 = vadd.f32 %v929_v62, %v928_v61 }
 0x358   : > { %931 = vadd.xlane.f32.xlu0 %v930_v63 }
 0x3e5   : > { %v932_v0 = vpop.xlane.xlu0 %931 }
 0x3e6   : > { %v933_v3 = vrot.slane %v932_v0, 4 }
 0x3e8   : > { %v934_v4 = vadd.f32 %v933_v3, %v932_v0 }
 0x3ea   : > { %v935_v5 = vrot.slane %v934_v4, 2 }
 0x3ec   : > { %v936_v6 = vadd.f32 %v935_v5, %v934_v4 }
 0x3ee   : > { %v937_v7 = vrot.slane %v936_v6, 1 }
 0x3f0   : > { %v938_v8 = vadd.f32 %v937_v7, %v936_v6 }
 0x3f2   : > { %1253 = vpush %v938_v8 }
 0x423   : > { %s1254_s14 = spop %1253 }
 0x424   : > { %v941_v9 = vstv %s1254_s14 }
 0x425   : > { %942 = vst [vmem:[%s234_s11] sm:$0xff] %v941_v9 }
 0x426   : > { %1317 = shalt.err (!%p1314_p3)
}
 0x427   : > { %s1318_s6 = scalar_lea.hbm %s1708_s17, 128  ;;  %s1322_s9 = scalar_lea.hbm %s1753_s5, 256 }
 0x428   : > { %p1319_p4 = scmp.ne.s32.totalorder %s1708_s17, %s1318_s6  ;;  %p1323_p9 = scmp.lt.u32.totalorder %s1708_s17, %s1753_s5 }
 0x429   : > { %p1324_p10 = scmp.lt.u32.totalorder %s1322_s9, %s1318_s6  ;;  %p1326_p12 = scmp.lt.u32.totalorder %s1318_s6, %s1708_s17 }
 0x42a   : > { %p1320_p7 = pnand %p1319_p4, %p1441_p5 }
 0x42b   : > { %p1325_p11 = por %p1324_p10, %p1323_p9 }
 0x42c   : > { %p1321_p8 = pneg %p1320_p7 }
 0x42d   : > { %p1327_p13 = por %p1326_p12, %p1325_p11 }
 0x42f   : > { %p1328_p0 = pnand %p1327_p13, %p1321_p8 }
 0x431   : > { %1331 = shalt.err (!%p1328_p0)
}
 0x432   : > { %1255 = dma.vmem_to_hbm [thread:$0]  (%p1441_p5), %s1703_s12, 128, %s1708_s17, %s944_s23  }
 0x433 PF: > { %p1261_p1 = scmp.ge.s32.totalorder %s1366_s21, 2  ;;  %s969_s13 = sand.u32 1, %s1354_s18  }
 0x434   : > { %s970_s14 = scalar_lea.sflag [#allocation3], %s969_s13 }
 0x435   : > { %p1258_p2 = pnand %p1261_p1, %p1445_p6 }
 0x437   : > { %1349 = dma.done.wait (!%p1258_p2), %s970_s14, 128  }
 0x438   : > { %1351 = vsyncadd (!%p1258_p2), %s970_s14, 4294967168  ;;  %p15_p3 = scmp.ge.s32.totalorder %s1428_s24, 4   ;;  %s1756_s18 = smov %s1358_s19 }
 0x439   : > { %s1757_s19 = smov %s1362_s20  ;;  %s1758_s20 = smov %s1439_s27 }
 0x43a   : > { %s1759_s21 = smov %s1428_s24  ;;  %17 = sbr.rel (!%p15_p3) target bundleno = 3 (0x3), region = 78 }
 0x441   :  { %975 = vsyncpa [#allocation3], 1 }
 0x442   :  { %977 = vsyncpa [#allocation3 + $0x1], 1 }

</bundles_post_ra>
